<compile_context>
chip_gen: v7x
topology: tpu7x:2x2x1
jax: 0.10.0
libtpu: 0.0.40
codegen_flags: <defaults>
</compile_context>

<pallas_src>
import functools

import jax
import jax.numpy as jnp
from jax.experimental import pallas as pl
from jax.experimental.pallas import tpu as pltpu


def _round_up(x: int, m: int) -> int:
    return (x + m - 1) // m * m


def _choose_batch_tile(b_pad: int, max_tb: int = 2048) -> int:
    """Largest power-of-two, multiple-of-128 tile <= max_tb that divides b_pad,
    preferring a grid length >= 2 (keeps both v7x TensorCores busy)."""
    tb = 128
    while tb < max_tb and b_pad % (2 * tb) == 0 and b_pad // (2 * tb) >= 2:
        tb *= 2
    return tb


def irt_kernel(theta_ref, alpha_ref, out_ref):
    # theta_ref / alpha_ref: (D_pad, TB) -- embedding dim on sublanes, batch on lanes.
    # Sublane row D carries (ones, beta) so the bias is folded into the reduction;
    # remaining padded sublane rows are zero in both operands (neutral).
    prod = theta_ref[...] * alpha_ref[...]        # VPU elementwise
    s = jnp.sum(prod, axis=0, keepdims=True)      # (1, TB) sublane reduction (XLU)
    out_ref[...] = jax.nn.sigmoid(s)              # EUP transcendental, lane-dense store


def prepare_irt_tables(theta_w, alpha_w, beta_w):
    """One-time O(table) preparation: transpose, pad D -> D_pad, fold beta in.

    theta_w : (num_students, D)   f32
    alpha_w : (num_questions, D)  f32
    beta_w  : (num_questions, 1)  f32
    returns : theta_aug (D_pad, num_students), alpha_aug (D_pad, num_questions)
    """
    num_students, D = theta_w.shape
    num_questions = alpha_w.shape[0]
    D_pad = _round_up(D + 1, 8)

    theta_aug = jnp.zeros((D_pad, num_students), jnp.float32)
    theta_aug = theta_aug.at[:D, :].set(theta_w.T.astype(jnp.float32))
    theta_aug = theta_aug.at[D, :].set(1.0)                       # ones row -> + beta

    alpha_aug = jnp.zeros((D_pad, num_questions), jnp.float32)
    alpha_aug = alpha_aug.at[:D, :].set(alpha_w.T.astype(jnp.float32))
    alpha_aug = alpha_aug.at[D, :].set(beta_w[:, 0].astype(jnp.float32))
    return theta_aug, alpha_aug


@functools.partial(jax.jit, static_argnames=("max_tb",))
def irt_forward(theta_aug, alpha_aug, student_ids, question_ids, *, max_tb=2048):
    """Per-batch IRT forward using pre-augmented tables.

    theta_aug : (D_pad, num_students)  f32  (row D_pad-? holds ones)
    alpha_aug : (D_pad, num_questions) f32  (matching row holds beta)
    student_ids, question_ids : (B,) int32
    returns   : (B, 1) f32 == sigmoid(sum(alpha*theta, dim=1, keepdim=True) + beta)
    """
    B = student_ids.shape[0]
    D_pad = theta_aug.shape[0]

    # Gather columns directly into the padded / transposed kernel layout.
    B_pad = _round_up(max(B, 128), 128)
    sid_p = jnp.zeros((B_pad,), jnp.int32).at[:B].set(student_ids.astype(jnp.int32))
    qid_p = jnp.zeros((B_pad,), jnp.int32).at[:B].set(question_ids.astype(jnp.int32))
    theta_t = jnp.take(theta_aug, sid_p, axis=1)                  # (D_pad, B_pad)
    alpha_t = jnp.take(alpha_aug, qid_p, axis=1)                  # (D_pad, B_pad)

    tb = _choose_batch_tile(B_pad, max_tb)
    grid = (B_pad // tb,)

    out = pl.pallas_call(
        irt_kernel,
        out_shape=jax.ShapeDtypeStruct((1, B_pad), jnp.float32),
        grid_spec=pltpu.PrefetchScalarGridSpec(
            num_scalar_prefetch=0,
            grid=grid,
            in_specs=[
                pl.BlockSpec((D_pad, tb), lambda i: (0, i)),      # theta columns
                pl.BlockSpec((D_pad, tb), lambda i: (0, i)),      # alpha (+beta) columns
            ],
            out_specs=pl.BlockSpec((1, tb), lambda i: (0, i)),    # lane-dense output row
        ),
        compiler_params=pltpu.CompilerParams(
            dimension_semantics=("parallel",)),
    )(theta_t, alpha_t)

    # Padded batch lanes (gathered with id 0) are sliced off; reshape to (B, 1).
    return out[0, :B].reshape(B, 1)


def irt_forward_from_weights(theta_w, alpha_w, beta_w, student_ids, question_ids):
    """Convenience path matching the PyTorch forward signature (raw weights in)."""
    theta_aug, alpha_aug = prepare_irt_tables(theta_w, alpha_w, beta_w)
    return irt_forward(theta_aug, alpha_aug, student_ids, question_ids)


def init_irt_params(key, num_students, num_questions, num_dim):
    """Deterministic xavier_normal_ init matching the PyTorch __init__."""
    k_theta, k_alpha, k_beta = jax.random.split(key, 3)

    def xavier_normal(k, shape):
        fan_out, fan_in = shape  # nn.Embedding weight: (num_embeddings, dim)
        std = jnp.sqrt(2.0 / (fan_in + fan_out))
        return (jax.random.normal(k, shape, jnp.float32) * std).astype(jnp.float32)

    theta_w = xavier_normal(k_theta, (num_students, num_dim))
    alpha_w = xavier_normal(k_alpha, (num_questions, num_dim))
    beta_w = xavier_normal(k_beta, (num_questions, 1))
    # TODO(synk): stu_set / load_theta_from_json branch (checkpoint load from disk)
    # is out of scope for a self-contained kernel; xavier init is used instead.
    return theta_w, alpha_w, beta_w


if __name__ == "__main__":
    num_students, num_questions, num_dim = 32, 20, 16
    batch = 8

    key = jax.random.PRNGKey(0)
    k_params, k_sid, k_qid = jax.random.split(key, 3)
    theta_w, alpha_w, beta_w = init_irt_params(
        k_params, num_students, num_questions, num_dim)

    student_ids = jax.random.randint(k_sid, (batch,), 0, num_students, dtype=jnp.int32)
    question_ids = jax.random.randint(k_qid, (batch,), 0, num_questions, dtype=jnp.int32)

    # One-time table preparation, then the jitted per-batch path.
    theta_aug, alpha_aug = prepare_irt_tables(theta_w, alpha_w, beta_w)
    pred = irt_forward(theta_aug, alpha_aug, student_ids, question_ids)
    pred = jax.block_until_ready(pred)

    # Pure-JAX reference for correctness.
    ref = jax.nn.sigmoid(
        jnp.sum(alpha_w[question_ids] * theta_w[student_ids], axis=1, keepdims=True)
        + beta_w[question_ids]
    )
    assert pred.shape == (batch, 1), pred.shape
    assert jnp.allclose(pred, ref, atol=1e-6), "mismatch vs reference"

    print("KERNEL_OK")
</pallas_src>

<mosaic_0001>
module attributes {stable_mosaic.version = 11 : i64} {
  func.func @irt_kernel(%arg0: i32, %arg1: memref<24x128xf32, #tpu.memory_space<vmem>>, %arg2: memref<24x128xf32, #tpu.memory_space<vmem>>, %arg3: memref<1x128xf32, #tpu.memory_space<vmem>>) attributes {dimension_semantics = [#tpu.dimension_semantics<parallel>], iteration_bounds = array<i64: 1>, scalar_prefetch = 0 : i64, scratch_operands = 0 : i64, tpu.core_type = #tpu.core_type<tc>, window_params = [{transform_indices = @transform_0, window_bounds = array<i64: 24, 128>}, {transform_indices = @transform_1, window_bounds = array<i64: 24, 128>}, {transform_indices = @transform_2, window_bounds = array<i64: 1, 128>}]} {
    %c0 = arith.constant 0 : index
    %c0_0 = arith.constant 0 : index
    %0 = vector.load %arg1[%c0, %c0_0] : memref<24x128xf32, #tpu.memory_space<vmem>>, vector<24x128xf32>
    %c0_1 = arith.constant 0 : index
    %c0_2 = arith.constant 0 : index
    %1 = vector.load %arg2[%c0_1, %c0_2] : memref<24x128xf32, #tpu.memory_space<vmem>>, vector<24x128xf32>
    %2 = arith.mulf %0, %1 : vector<24x128xf32>
    %cst = arith.constant dense<0.000000e+00> : vector<128xf32>
    %3 = vector.multi_reduction <add>, %2, %cst [0] : vector<24x128xf32> to vector<128xf32>
    %4 = vector.shape_cast %3 : vector<128xf32> to vector<1x128xf32>
    %5 = arith.negf %4 : vector<1x128xf32>
    %6 = math.exp %5 : vector<1x128xf32>
    %cst_3 = arith.constant 1.000000e+00 : f32
    %7 = vector.broadcast %cst_3 : f32 to vector<1x128xf32>
    %8 = arith.addf %7, %6 : vector<1x128xf32>
    %9 = arith.divf %7, %8 : vector<1x128xf32>
    %c0_4 = arith.constant 0 : index
    %c0_5 = arith.constant 0 : index
    %10 = vector.load %arg3[%c0_4, %c0_5] : memref<1x128xf32, #tpu.memory_space<vmem>>, vector<1x128xf32>
    tpu.vector_store %arg3[%c0_4, %c0_5], %9 {strides = array<i32>} : memref<1x128xf32, #tpu.memory_space<vmem>>, vector<1x128xf32>,
    return
  }
  func.func @transform_0(%arg0: i32) -> (i32, i32) {
    %c0_i32 = arith.constant 0 : i32
    %c0_i32_0 = arith.constant 0 : i32
    return %c0_i32, %arg0 : i32, i32
  }
  func.func @transform_1(%arg0: i32) -> (i32, i32) {
    %c0_i32 = arith.constant 0 : i32
    %c0_i32_0 = arith.constant 0 : i32
    return %c0_i32, %arg0 : i32, i32
  }
  func.func @transform_2(%arg0: i32) -> (i32, i32) {
    %c0_i32 = arith.constant 0 : i32
    %c0_i32_0 = arith.constant 0 : i32
    return %c0_i32, %arg0 : i32, i32
  }
}

</mosaic_0001>

<bundles_post_ra>
// kernel: irt_forward.1
= control target key start
LH: loop header
LB: loop body
LE: loop exit
PB: predicated region body
PF: predicated region fallthrough
CT: control target
= control target key end

     0   :  { %s80_s0 = inlined_call_operand.vmem [shape: f32[24,128], index: 0, kind: input, shape index: {}]   ;;  %s81_s1 = inlined_call_operand.vmem [shape: f32[24,128], index: 1, kind: input, shape index: {}]   ;;  %s82_s2 = inlined_call_operand.vmem [shape: f32[1,128], index: 2, kind: output, shape index: {}]  }
   0x1   :  { %v11_v0 = vld [vmem:[%s80_s0] sm:$0xff]  ;;  %v12_v1 = vld [vmem:[%s80_s0 + $0x8] sm:$0xff]  ;;  %v13_v2 = vld [vmem:[%s80_s0 + $0x10] sm:$0xff] }
   0x2   :  { %v14_v3 = vld [vmem:[%s81_s1] sm:$0xff]  ;;  %v15_v4 = vld [vmem:[%s81_s1 + $0x8] sm:$0xff]  ;;  %v16_v5 = vld [vmem:[%s81_s1 + $0x10] sm:$0xff] }
   0x3   :  { %v17_v6 = vmul.f32 %v14_v3, %v11_v0  ;;  %v18_v7 = vmul.f32 %v15_v4, %v12_v1  ;;  %v19_v8 = vmul.f32 %v16_v5, %v13_v2 }
   0x5   :  { %v20_v9 = vadd.f32 %v18_v7, %v17_v6 }
   0x7   :  { %v21_v10 = vadd.f32 %v20_v9, %v19_v8 }
   0x9   :  { %v22_v11 = vrot.slane %v21_v10, 4 }
   0xb   :  { %v23_v12 = vadd.f32 %v22_v11, %v21_v10 }
   0xd   :  { %v24_v13 = vrot.slane %v23_v12, 2 }
   0xf   :  { %v25_v14 = vadd.f32 %v24_v13, %v23_v12 }
  0x11   :  { %v26_v15 = vrot.slane %v25_v14, 1 }
  0x13   :  { %v27_v16 = vadd.f32 %v26_v15, %v25_v14 }
  0x15   :  { %v39_v17 = vmul.f32 -1.442695, %v27_v16 }
  0x17   :  { %40 = vpow2.f32 %v39_v17 }
  0x21   :  { %v41_v18 = vpop.eup %40 }
  0x22   :  { %v31_v19 = vadd.f32 1.0, %v41_v18 }
  0x24   :  { %42 = vrcp.f32 %v31_v19 }
  0x2e   :  { %v43_v20 = vpop.eup %42 }
  0x2f   :  { %34 = vst [vmem:[%s82_s2] sm:$0x1] %v43_v20 }

</bundles_post_ra>
